<compile_context>
chip_gen: v6e
topology: v6e:2x2x1
jax: 0.10.0
libtpu: 0.0.40
codegen_flags: <defaults>
</compile_context>

<pallas_src>
import functools

import jax
import jax.numpy as jnp
import numpy as np
from jax import lax
from jax.experimental import pallas as pl
from jax.experimental.pallas import tpu as pltpu


# ----------------------------- Pallas kernel -------------------------------- #
def classify_kernel(pooled_ref,   # [T*Bc, CK3]  pooled patch-means, rows ordered (t, b)
                    wconv_ref,    # [CK3, F]
                    bconv_ref,    # [1, F]
                    w1_ref,       # [F, E]
                    b1_ref,       # [1, E]
                    w2_ref,       # [E, E]
                    b2_ref,       # [1, E]
                    wf_ref,       # [T, E, C]   (final_fc weight reshaped)
                    bf_ref,       # [1, C]
                    out_ref):     # [Bc, C]
    Bc = out_ref.shape[0]
    T = wf_ref.shape[0]

    # 1) conv + global average pooling (linearity: mean(patches) @ Wconv == mean(conv))
    pooled = pooled_ref[...]                                              # [T*Bc, CK3]
    conv = jnp.dot(pooled, wconv_ref[...],
                   preferred_element_type=jnp.float32) + bconv_ref[...]   # [T*Bc, F]

    # 2) MLP: Linear -> Sigmoid -> Linear   (all batch*time rows in one matmul)
    h = jax.nn.sigmoid(jnp.dot(conv, w1_ref[...],
                               preferred_element_type=jnp.float32) + b1_ref[...])
    h = jnp.dot(h, w2_ref[...],
                preferred_element_type=jnp.float32) + b2_ref[...]          # [T*Bc, E]

    # 3) final FC over the flattened [T*E] features:
    #    logits[b] = bf + sum_t h[t, b] @ wf[t]
    #    Per-t partial products are independent (no serial MXU dependency chain);
    #    their sum is a handful of tiny VPU adds.
    wf = wf_ref[...]                                                       # [T, E, C]
    parts = [jnp.dot(h[t * Bc:(t + 1) * Bc, :], wf[t],
                     preferred_element_type=jnp.float32) for t in range(T)]
    logits = bf_ref[...] + functools.reduce(lambda a, b: a + b, parts)     # [Bc, C]

    # 4) softmax over classes (reciprocal on the EUP slot)
    m = jnp.max(logits, axis=-1, keepdims=True)
    e = jnp.exp(logits - m)
    s = jnp.sum(e, axis=-1, keepdims=True)
    out_ref[...] = e * pl.reciprocal(s, approx=True)


# ------------------------------- JAX glue ------------------------------------ #
def _num_batch_chunks(B):
    """2 batch chunks on v7x (2 TensorCores/chip, 'parallel' grid axis), else 1."""
    try:
        kind = jax.devices()[0].device_kind.lower()
    except Exception:
        kind = ""
    if "7" in kind and B % 2 == 0:
        return 2
    return 1


def pooled_patch_means(x, K):
    """x: [B, Cin, D, H, W, T] -> [B, T, Cin*K^3].

    Entry (c, kd, kh, kw) is the mean over all valid conv-output positions of the
    shifted input slice; ordering is row-major (c, kd, kh, kw) to match
    Conv3d weight.reshape(F, Cin*K^3)."""
    B, Cin, D, H, W, T = x.shape
    Do, Ho, Wo = D - K + 1, H - K + 1, W - K + 1
    P = Do * Ho * Wo
    win = lax.reduce_window(x, 0.0, lax.add,
                            window_dimensions=(1, 1, Do, Ho, Wo, 1),
                            window_strides=(1, 1, 1, 1, 1, 1),
                            padding="VALID")                   # [B, Cin, K, K, K, T]
    pooled = jnp.transpose(win, (0, 5, 1, 2, 3, 4)).reshape(B, T, Cin * K ** 3)
    return pooled / P


def forward_pallas(x, params):
    B, Cin, D, H, W, T = x.shape
    F = params["wconv"].shape[0]
    K = params["wconv"].shape[2]
    E = params["w1"].shape[1]
    C = params["bf"].shape[-1]
    CK3 = Cin * K ** 3

    G = _num_batch_chunks(B)        # 1 on v5e/v6e, 2 on v7x (when B is even)
    Bc = B // G
    TBc = T * Bc

    pooled = pooled_patch_means(x, K)                          # [B, T, CK3]  (tiny)
    # Chunk over batch; within a chunk, order rows (t, local_b) so per-timestep
    # slices for the final FC are contiguous.
    pooled_g = (pooled.reshape(G, Bc, T, CK3)
                      .transpose(0, 2, 1, 3)
                      .reshape(G, TBc, CK3))

    wconv = params["wconv"].reshape(F, CK3).T                  # [CK3, F]
    bconv = params["bconv"].reshape(1, F)
    b1 = params["b1"].reshape(1, E)
    b2 = params["b2"].reshape(1, E)
    wf3 = params["wf"].reshape(T, E, C)
    bf = params["bf"].reshape(1, C)

    out = pl.pallas_call(
        classify_kernel,
        out_shape=jax.ShapeDtypeStruct((B, C), jnp.float32),
        grid=(G,),
        in_specs=[
            pl.BlockSpec((None, TBc, CK3), lambda g: (g, 0, 0)),
            pl.BlockSpec((CK3, F), lambda g: (0, 0)),
            pl.BlockSpec((1, F), lambda g: (0, 0)),
            pl.BlockSpec((F, E), lambda g: (0, 0)),
            pl.BlockSpec((1, E), lambda g: (0, 0)),
            pl.BlockSpec((E, E), lambda g: (0, 0)),
            pl.BlockSpec((1, E), lambda g: (0, 0)),
            pl.BlockSpec((T, E, C), lambda g: (0, 0, 0)),
            pl.BlockSpec((1, C), lambda g: (0, 0)),
        ],
        out_specs=pl.BlockSpec((Bc, C), lambda g: (g, 0)),
        compiler_params=pltpu.CompilerParams(dimension_semantics=("parallel",)),
    )(pooled_g, wconv, bconv, params["w1"], b1, params["w2"], b2, wf3, bf)
    return out


# ----------------------------- pure-JAX reference ----------------------------- #
def forward_reference(x, params):
    B, Cin, D, H, W, T = x.shape
    outs = []
    for t in range(T):
        xt = x[..., t]                                                    # [B, Cin, D, H, W]
        conv = jax.lax.conv_general_dilated(
            xt, params["wconv"], window_strides=(1, 1, 1), padding="VALID",
            dimension_numbers=("NCDHW", "OIDHW", "NCDHW"))
        conv = conv + params["bconv"][None, :, None, None, None]
        outs.append(conv.mean(axis=(2, 3, 4)))                            # [B, F]
    conv_out = jnp.stack(outs, axis=1)                                    # [B, T, F]
    h = jax.nn.sigmoid(conv_out @ params["w1"] + params["b1"])
    h = h @ params["w2"] + params["b2"]                                   # [B, T, E]
    flat = h.reshape(B, -1)                                               # [B, T*E]
    logits = flat @ params["wf"] + params["bf"]                           # [B, C]
    return jax.nn.softmax(logits, axis=1)


# ---------------------------------- main -------------------------------------- #
if __name__ == "__main__":
    # module hyperparameters
    n_classes = 5
    n_filters = 8
    conv_kernel_size = 3
    embedding_size = 32
    n_windows = 4          # stored but unused in forward (kept for parity)
    seq_len = 4

    B, Cin, D, H, W = 2, 2, 6, 6, 6

    key = jax.random.PRNGKey(0)
    keys = jax.random.split(key, 9)
    s = 0.1
    params = {
        "wconv": s * jax.random.normal(
            keys[0], (n_filters, Cin, conv_kernel_size, conv_kernel_size, conv_kernel_size),
            jnp.float32),
        "bconv": s * jax.random.normal(keys[1], (n_filters,), jnp.float32),
        "w1": s * jax.random.normal(keys[2], (n_filters, embedding_size), jnp.float32),
        "b1": s * jax.random.normal(keys[3], (embedding_size,), jnp.float32),
        "w2": s * jax.random.normal(keys[4], (embedding_size, embedding_size), jnp.float32),
        "b2": s * jax.random.normal(keys[5], (embedding_size,), jnp.float32),
        "wf": s * jax.random.normal(keys[6], (seq_len * embedding_size, n_classes), jnp.float32),
        "bf": s * jax.random.normal(keys[7], (n_classes,), jnp.float32),
    }

    x = jax.random.normal(keys[8], (B, Cin, D, H, W, seq_len), jnp.float32)

    fwd = jax.jit(forward_pallas)
    out = jax.block_until_ready(fwd(x, params))

    ref = jax.block_until_ready(forward_reference(x, params))
    np.testing.assert_allclose(np.asarray(out), np.asarray(ref), atol=5e-3, rtol=5e-3)
    assert out.shape == (B, n_classes)
    # approx reciprocal in the softmax => row sums are 1 to ~1e-4 relative
    np.testing.assert_allclose(np.asarray(out).sum(axis=1), np.ones(B), atol=2e-3)

    print("KERNEL_OK")
</pallas_src>

<mosaic_0001>
module attributes {stable_mosaic.version = 11 : i64} {
  func.func @classify_kernel(%arg0: i32, %arg1: memref<1x8x54xf32, #tpu.memory_space<vmem>>, %arg2: memref<54x8xf32, #tpu.memory_space<vmem>>, %arg3: memref<1x8xf32, #tpu.memory_space<vmem>>, %arg4: memref<8x32xf32, #tpu.memory_space<vmem>>, %arg5: memref<1x32xf32, #tpu.memory_space<vmem>>, %arg6: memref<32x32xf32, #tpu.memory_space<vmem>>, %arg7: memref<1x32xf32, #tpu.memory_space<vmem>>, %arg8: memref<4x32x5xf32, #tpu.memory_space<vmem>>, %arg9: memref<1x5xf32, #tpu.memory_space<vmem>>, %arg10: memref<2x5xf32, #tpu.memory_space<vmem>>) attributes {dimension_semantics = [#tpu.dimension_semantics<parallel>], iteration_bounds = array<i64: 1>, scalar_prefetch = 0 : i64, scratch_operands = 0 : i64, tpu.core_type = #tpu.core_type<tc>, window_params = [{transform_indices = @transform_0, window_bounds = array<i64: 1, 8, 54>}, {pipeline_mode = #tpu.pipeline_mode<synchronous>, transform_indices = @transform_1, window_bounds = array<i64: 54, 8>}, {pipeline_mode = #tpu.pipeline_mode<synchronous>, transform_indices = @transform_2, window_bounds = array<i64: 1, 8>}, {pipeline_mode = #tpu.pipeline_mode<synchronous>, transform_indices = @transform_3, window_bounds = array<i64: 8, 32>}, {pipeline_mode = #tpu.pipeline_mode<synchronous>, transform_indices = @transform_4, window_bounds = array<i64: 1, 32>}, {pipeline_mode = #tpu.pipeline_mode<synchronous>, transform_indices = @transform_5, window_bounds = array<i64: 32, 32>}, {pipeline_mode = #tpu.pipeline_mode<synchronous>, transform_indices = @transform_6, window_bounds = array<i64: 1, 32>}, {pipeline_mode = #tpu.pipeline_mode<synchronous>, transform_indices = @transform_7, window_bounds = array<i64: 4, 32, 5>}, {pipeline_mode = #tpu.pipeline_mode<synchronous>, transform_indices = @transform_8, window_bounds = array<i64: 1, 5>}, {transform_indices = @transform_9, window_bounds = array<i64: 2, 5>}]} {
    %c0 = arith.constant 0 : index
    %c0_0 = arith.constant 0 : index
    %c0_1 = arith.constant 0 : index
    %0 = vector.load %arg1[%c0, %c0_0, %c0_1] : memref<1x8x54xf32, #tpu.memory_space<vmem>>, vector<1x8x54xf32>
    %1 = vector.shape_cast %0 : vector<1x8x54xf32> to vector<8x54xf32>
    %c0_2 = arith.constant 0 : index
    %c0_3 = arith.constant 0 : index
    %2 = vector.load %arg2[%c0_2, %c0_3] : memref<54x8xf32, #tpu.memory_space<vmem>>, vector<54x8xf32>
    %cst = arith.constant dense<0.000000e+00> : vector<8x8xf32>
    %3 = tpu.matmul %1, %2, %cst {dimension_numbers = #tpu.dot_dimension_numbers<[1], [0], [0], [1], [0, 0, 1, 1], [], []>} : vector<8x54xf32>, vector<54x8xf32>, vector<8x8xf32> -> vector<8x8xf32>
    %c0_4 = arith.constant 0 : index
    %c0_5 = arith.constant 0 : index
    %4 = vector.load %arg3[%c0_4, %c0_5] : memref<1x8xf32, #tpu.memory_space<vmem>>, vector<1x8xf32>
    %5 = vector.broadcast %4 : vector<1x8xf32> to vector<8x8xf32>
    %6 = arith.addf %3, %5 : vector<8x8xf32>
    %c0_6 = arith.constant 0 : index
    %c0_7 = arith.constant 0 : index
    %7 = vector.load %arg4[%c0_6, %c0_7] : memref<8x32xf32, #tpu.memory_space<vmem>>, vector<8x32xf32>
    %cst_8 = arith.constant dense<0.000000e+00> : vector<8x32xf32>
    %8 = tpu.matmul %6, %7, %cst_8 {dimension_numbers = #tpu.dot_dimension_numbers<[1], [0], [0], [1], [0, 0, 1, 1], [], []>} : vector<8x8xf32>, vector<8x32xf32>, vector<8x32xf32> -> vector<8x32xf32>
    %c0_9 = arith.constant 0 : index
    %c0_10 = arith.constant 0 : index
    %9 = vector.load %arg5[%c0_9, %c0_10] : memref<1x32xf32, #tpu.memory_space<vmem>>, vector<1x32xf32>
    %10 = vector.broadcast %9 : vector<1x32xf32> to vector<8x32xf32>
    %11 = arith.addf %8, %10 : vector<8x32xf32>
    %12 = arith.negf %11 : vector<8x32xf32>
    %13 = math.exp %12 : vector<8x32xf32>
    %cst_11 = arith.constant 1.000000e+00 : f32
    %14 = vector.broadcast %cst_11 : f32 to vector<8x32xf32>
    %15 = arith.addf %14, %13 : vector<8x32xf32>
    %16 = arith.divf %14, %15 : vector<8x32xf32>
    %c0_12 = arith.constant 0 : index
    %c0_13 = arith.constant 0 : index
    %17 = vector.load %arg6[%c0_12, %c0_13] : memref<32x32xf32, #tpu.memory_space<vmem>>, vector<32x32xf32>
    %cst_14 = arith.constant dense<0.000000e+00> : vector<8x32xf32>
    %18 = tpu.matmul %16, %17, %cst_14 {dimension_numbers = #tpu.dot_dimension_numbers<[1], [0], [0], [1], [0, 0, 1, 1], [], []>} : vector<8x32xf32>, vector<32x32xf32>, vector<8x32xf32> -> vector<8x32xf32>
    %c0_15 = arith.constant 0 : index
    %c0_16 = arith.constant 0 : index
    %19 = vector.load %arg7[%c0_15, %c0_16] : memref<1x32xf32, #tpu.memory_space<vmem>>, vector<1x32xf32>
    %20 = vector.broadcast %19 : vector<1x32xf32> to vector<8x32xf32>
    %21 = arith.addf %18, %20 : vector<8x32xf32>
    %c0_17 = arith.constant 0 : index
    %c0_18 = arith.constant 0 : index
    %c0_19 = arith.constant 0 : index
    %22 = vector.load %arg8[%c0_17, %c0_18, %c0_19] : memref<4x32x5xf32, #tpu.memory_space<vmem>>, vector<4x32x5xf32>
    %23 = vector.extract_strided_slice %21 {offsets = [0, 0], sizes = [2, 32], strides = [1, 1]} : vector<8x32xf32> to vector<2x32xf32>
    %24 = vector.extract_strided_slice %22 {offsets = [0, 0, 0], sizes = [1, 32, 5], strides = [1, 1, 1]} : vector<4x32x5xf32> to vector<1x32x5xf32>
    %25 = vector.shape_cast %24 : vector<1x32x5xf32> to vector<32x5xf32>
    %cst_20 = arith.constant dense<0.000000e+00> : vector<2x5xf32>
    %26 = tpu.matmul %23, %25, %cst_20 {dimension_numbers = #tpu.dot_dimension_numbers<[1], [0], [0], [1], [0, 0, 1, 1], [], []>} : vector<2x32xf32>, vector<32x5xf32>, vector<2x5xf32> -> vector<2x5xf32>
    %27 = vector.extract_strided_slice %21 {offsets = [2, 0], sizes = [2, 32], strides = [1, 1]} : vector<8x32xf32> to vector<2x32xf32>
    %28 = vector.extract_strided_slice %22 {offsets = [1, 0, 0], sizes = [1, 32, 5], strides = [1, 1, 1]} : vector<4x32x5xf32> to vector<1x32x5xf32>
    %29 = vector.shape_cast %28 : vector<1x32x5xf32> to vector<32x5xf32>
    %cst_21 = arith.constant dense<0.000000e+00> : vector<2x5xf32>
    %30 = tpu.matmul %27, %29, %cst_21 {dimension_numbers = #tpu.dot_dimension_numbers<[1], [0], [0], [1], [0, 0, 1, 1], [], []>} : vector<2x32xf32>, vector<32x5xf32>, vector<2x5xf32> -> vector<2x5xf32>
    %31 = vector.extract_strided_slice %21 {offsets = [4, 0], sizes = [2, 32], strides = [1, 1]} : vector<8x32xf32> to vector<2x32xf32>
    %32 = vector.extract_strided_slice %22 {offsets = [2, 0, 0], sizes = [1, 32, 5], strides = [1, 1, 1]} : vector<4x32x5xf32> to vector<1x32x5xf32>
    %33 = vector.shape_cast %32 : vector<1x32x5xf32> to vector<32x5xf32>
    %cst_22 = arith.constant dense<0.000000e+00> : vector<2x5xf32>
    %34 = tpu.matmul %31, %33, %cst_22 {dimension_numbers = #tpu.dot_dimension_numbers<[1], [0], [0], [1], [0, 0, 1, 1], [], []>} : vector<2x32xf32>, vector<32x5xf32>, vector<2x5xf32> -> vector<2x5xf32>
    %35 = vector.extract_strided_slice %21 {offsets = [6, 0], sizes = [2, 32], strides = [1, 1]} : vector<8x32xf32> to vector<2x32xf32>
    %36 = vector.extract_strided_slice %22 {offsets = [3, 0, 0], sizes = [1, 32, 5], strides = [1, 1, 1]} : vector<4x32x5xf32> to vector<1x32x5xf32>
    %37 = vector.shape_cast %36 : vector<1x32x5xf32> to vector<32x5xf32>
    %cst_23 = arith.constant dense<0.000000e+00> : vector<2x5xf32>
    %38 = tpu.matmul %35, %37, %cst_23 {dimension_numbers = #tpu.dot_dimension_numbers<[1], [0], [0], [1], [0, 0, 1, 1], [], []>} : vector<2x32xf32>, vector<32x5xf32>, vector<2x5xf32> -> vector<2x5xf32>
    %c0_24 = arith.constant 0 : index
    %c0_25 = arith.constant 0 : index
    %39 = vector.load %arg9[%c0_24, %c0_25] : memref<1x5xf32, #tpu.memory_space<vmem>>, vector<1x5xf32>
    %40 = arith.addf %26, %30 : vector<2x5xf32>
    %41 = arith.addf %40, %34 : vector<2x5xf32>
    %42 = arith.addf %41, %38 : vector<2x5xf32>
    %43 = vector.broadcast %39 : vector<1x5xf32> to vector<2x5xf32>
    %44 = arith.addf %43, %42 : vector<2x5xf32>
    %cst_26 = arith.constant dense<0xFF800000> : vector<2xf32>
    %45 = vector.multi_reduction <maximumf>, %44, %cst_26 [1] : vector<2x5xf32> to vector<2xf32>
    %46 = vector.shape_cast %45 : vector<2xf32> to vector<2x1xf32>
    %47 = vector.broadcast %46 : vector<2x1xf32> to vector<2x5xf32>
    %48 = arith.subf %44, %47 : vector<2x5xf32>
    %49 = math.exp %48 : vector<2x5xf32>
    %cst_27 = arith.constant dense<0.000000e+00> : vector<2xf32>
    %50 = vector.multi_reduction <add>, %49, %cst_27 [1] : vector<2x5xf32> to vector<2xf32>
    %51 = vector.shape_cast %50 : vector<2xf32> to vector<2x1xf32>
    %52 = tpu.reciprocal %51 {approx = true} : vector<2x1xf32> -> vector<2x1xf32>
    %53 = vector.broadcast %52 : vector<2x1xf32> to vector<2x5xf32>
    %54 = arith.mulf %49, %53 : vector<2x5xf32>
    %c0_28 = arith.constant 0 : index
    %c0_29 = arith.constant 0 : index
    %55 = vector.load %arg10[%c0_28, %c0_29] : memref<2x5xf32, #tpu.memory_space<vmem>>, vector<2x5xf32>
    tpu.vector_store %arg10[%c0_28, %c0_29], %54 {strides = array<i32>} : memref<2x5xf32, #tpu.memory_space<vmem>>, vector<2x5xf32>,
    return
  }
  func.func @transform_0(%arg0: i32) -> (i32, i32, i32) {
    %c0_i32 = arith.constant 0 : i32
    %c0_i32_0 = arith.constant 0 : i32
    %c0_i32_1 = arith.constant 0 : i32
    return %arg0, %c0_i32, %c0_i32_0 : i32, i32, i32
  }
  func.func @transform_1(%arg0: i32) -> (i32, i32) {
    %c0_i32 = arith.constant 0 : i32
    %c0_i32_0 = arith.constant 0 : i32
    %c0_i32_1 = arith.constant 0 : i32
    return %c0_i32, %c0_i32_0 : i32, i32
  }
  func.func @transform_2(%arg0: i32) -> (i32, i32) {
    %c0_i32 = arith.constant 0 : i32
    %c0_i32_0 = arith.constant 0 : i32
    %c0_i32_1 = arith.constant 0 : i32
    return %c0_i32, %c0_i32_0 : i32, i32
  }
  func.func @transform_3(%arg0: i32) -> (i32, i32) {
    %c0_i32 = arith.constant 0 : i32
    %c0_i32_0 = arith.constant 0 : i32
    %c0_i32_1 = arith.constant 0 : i32
    return %c0_i32, %c0_i32_0 : i32, i32
  }
  func.func @transform_4(%arg0: i32) -> (i32, i32) {
    %c0_i32 = arith.constant 0 : i32
    %c0_i32_0 = arith.constant 0 : i32
    %c0_i32_1 = arith.constant 0 : i32
    return %c0_i32, %c0_i32_0 : i32, i32
  }
  func.func @transform_5(%arg0: i32) -> (i32, i32) {
    %c0_i32 = arith.constant 0 : i32
    %c0_i32_0 = arith.constant 0 : i32
    %c0_i32_1 = arith.constant 0 : i32
    return %c0_i32, %c0_i32_0 : i32, i32
  }
  func.func @transform_6(%arg0: i32) -> (i32, i32) {
    %c0_i32 = arith.constant 0 : i32
    %c0_i32_0 = arith.constant 0 : i32
    %c0_i32_1 = arith.constant 0 : i32
    return %c0_i32, %c0_i32_0 : i32, i32
  }
  func.func @transform_7(%arg0: i32) -> (i32, i32, i32) {
    %c0_i32 = arith.constant 0 : i32
    %c0_i32_0 = arith.constant 0 : i32
    %c0_i32_1 = arith.constant 0 : i32
    %c0_i32_2 = arith.constant 0 : i32
    return %c0_i32, %c0_i32_0, %c0_i32_1 : i32, i32, i32
  }
  func.func @transform_8(%arg0: i32) -> (i32, i32) {
    %c0_i32 = arith.constant 0 : i32
    %c0_i32_0 = arith.constant 0 : i32
    %c0_i32_1 = arith.constant 0 : i32
    return %c0_i32, %c0_i32_0 : i32, i32
  }
  func.func @transform_9(%arg0: i32) -> (i32, i32) {
    %c0_i32 = arith.constant 0 : i32
    %c0_i32_0 = arith.constant 0 : i32
    return %arg0, %c0_i32 : i32, i32
  }
}

</mosaic_0001>

<bundles_post_ra>
// kernel: forward_pallas.1
= control target key start
LH: loop header
LB: loop body
LE: loop exit
PB: predicated region body
PF: predicated region fallthrough
CT: control target
= control target key end

     0   :  { %vm52_vm0 = vcmask 1045504   ;;  %v802_v1 = vmov 0.0   ;;  %vm803_vm1 = vmmov 0   ;;  %s1007_s0 = inlined_call_operand.vmem [shape: f32[1,8,54], index: 0, kind: input, shape index: {}]   ;;  %s1008_s1 = inlined_call_operand.vmem [shape: f32[54,8], index: 1, kind: input, shape index: {}]   ;;  %s1009_s2 = inlined_call_operand.vmem [shape: f32[1,8], index: 2, kind: input, shape index: {}]   ;;  %s1010_s3 = inlined_call_operand.vmem [shape: f32[8,32], index: 3, kind: input, shape index: {}]   ;;  %s1011_s4 = inlined_call_operand.vmem [shape: f32[1,32], index: 4, kind: input, shape index: {}]   ;;  %s1012_s5 = inlined_call_operand.vmem [shape: f32[32,32], index: 5, kind: input, shape index: {}]   ;;  %s1013_s6 = inlined_call_operand.vmem [shape: f32[1,32], index: 6, kind: input, shape index: {}]   ;;  %s1014_s7 = inlined_call_operand.vmem [shape: f32[4,32,5], index: 7, kind: input, shape index: {}]   ;;  %s1015_s8 = inlined_call_operand.vmem [shape: f32[1,5], index: 8, kind: input, shape index: {}]   ;;  %s1016_s9 = inlined_call_operand.hbm [shape: f32[2,5], index: 9, kind: output, shape index: {}]  }
   0x1   :  { %v40_v0 = vld [vmem:[%s1008_s1 + $0x30] sm:$0x3f]  ;;  %692 = vmatprep.subr.mxu0 %v802_v1  ;;  %v39_v2 = vld [vmem:[%s1008_s1 + $0x28] sm:$0xff]  ;;  %709 = vmatprep.subr.mxu1 %v802_v1  ;;  %v38_v3 = vld [vmem:[%s1008_s1 + $0x20] sm:$0xff] }
   0x2   :  { %693 = vmatpush3.msk.msra.mxu0 %vm52_vm0, %v40_v0  ;;  %706 = vmatprep.mubr.msk.f32.mxu0 %vm803_vm1, %v802_v1 }
   0x3   :  { %694 = vmatprep.subr.mxu0 %v802_v1  ;;  %711 = vmatprep.mubr.msk.f32.mxu1 %vm803_vm1, %v802_v1 }
   0x4   :  { %14 = vsyncpa [#allocation3], 0  ;;  %695 = vmatpush3.msra.mxu0 %v39_v2  ;;  %v37_v4 = vld [vmem:[%s1008_s1 + $0x18] sm:$0xff]  ;;  %v36_v5 = vld [vmem:[%s1008_s1 + $0x10] sm:$0xff]  ;;  %vm48_vm2 = vcmask 441344   ;;  %vm134_vm3 = vcmask 64512  }
   0x5   :  { %696 = vmatprep.subr.mxu0 %v802_v1  ;;  %v35_v6 = vld [vmem:[%s1008_s1 + $0x8] sm:$0xff]  ;;  %v34_v7 = vld [vmem:[%s1008_s1] sm:$0xff]  ;;  %v217_v14 = vld [vmem:[%s1012_s5 + $0x18] sm:$0xff]  ;;  %vm225_vm4 = vcmask 261120   ;;  %vm617_vm5 = vcmask 33792   ;;  %s804_s20 = smov [#allocation2]  }
   0x6   :  { %697 = vmatpush3.msra.mxu0 %v38_v3  ;;  %v33_v8 = vld [vmem:[%s1007_s0] sm:$0xff]  ;;  %v216_v15 = vld [vmem:[%s1012_s5 + $0x10] sm:$0xff]  ;;  %v215_v16 = vld [vmem:[%s1012_s5 + $0x8] sm:$0xff] }
   0x7   :  { %698 = vmatprep.subr.mxu0 %v802_v1  ;;  %v126_v9 = vld [vmem:[%s1010_s3] sm:$0xff]  ;;  %v310_v18 = vld [vmem:[%s1014_s7 + $0x58] sm:$0xff]  ;;  %v309_v19 = vld [vmem:[%s1014_s7 + $0x50] sm:$0xff] }
   0x8   :  { %699 = vmatpush3.msra.mxu0 %v37_v4  ;;  %710 = vmatpush3.msra.mxu1 %v126_v9  ;;  %v644_v10 = vld [vmem:[%s1009_s2] ss:$0 sm:$0xff]  ;;  %v306_v27 = vld [vmem:[%s1014_s7 + $0x38] sm:$0xff]  ;;  %v305_v29 = vld [vmem:[%s1014_s7 + $0x30] sm:$0xff] }
   0x9   :  { %700 = vmatprep.subr.mxu0 %v802_v1  ;;  %714 = vmatprep.subr.mxu1 %v802_v1  ;;  %v214_v17 = vld [vmem:[%s1012_s5] sm:$0xff]  ;;  %v304_v30 = vld [vmem:[%s1014_s7 + $0x28] sm:$0xff]  ;;  %v314_v40 = vld [vmem:[%s1014_s7 + $0x78] sm:$0xff] }
   0xa   :  { %701 = vmatpush3.msra.mxu0 %v36_v5  ;;  %v647_v20 = vld [vmem:[%s1011_s4] ss:$0 sm:$0xff]  ;;  %v308_v31 = vld [vmem:[%s1014_s7 + $0x48] sm:$0xff]  ;;  %v302_v41 = vld [vmem:[%s1014_s7 + $0x18] sm:$0xff]  ;;  %s636_s4 = sshll.u32 %s804_s20, 4  ;;  %s637_s4 = int_to_ptr.vmem [resolvable:$true] %s636_s4 }
   0xb   :  { %702 = vmatprep.subr.mxu0 %v802_v1  ;;  %v303_v32 = vld [vmem:[%s1014_s7 + $0x20] sm:$0xff]  ;;  %v313_v42 = vld [vmem:[%s1014_s7 + $0x70] sm:$0xff]  ;;  %v312_v44 = vld [vmem:[%s1014_s7 + $0x68] sm:$0xff]  ;;  %p785_p1 = scmp.lt.s32.totalorder %s637_s4, %s637_s4 }
   0xc   :  { %703 = vmatpush3.msra.mxu0 %v35_v6  ;;  %v307_v33 = vld [vmem:[%s1014_s7 + $0x40] sm:$0xff]  ;;  %v301_v43 = vld [vmem:[%s1014_s7 + $0x10] sm:$0xff]  ;;  %v300_v45 = vld [vmem:[%s1014_s7 + $0x8] sm:$0xff] }
   0xd   :  { %704 = vmatprep.subr.mxu0 %v802_v1  ;;  %v650_v34 = vld [vmem:[%s1013_s6] ss:$0 sm:$0xff] }
   0xe   :  { %705 = vmatpush3.msra.mxu0 %v34_v7  ;;  %v311_v46 = vld [vmem:[%s1014_s7 + $0x60] sm:$0xff] }
   0xf   :  { %707 = vmatmul.mubr.msk.f32.vlgmr.msra.gmra.mxu0 %vm48_vm2, %v33_v8  ;;  %736 = vmatprep.subr.mxu0 %v802_v1  ;;  %v299_v47 = vld [vmem:[%s1014_s7] sm:$0xff] }
  0x10   :  { %744 = vmatprep.mubr.msk.f32.mxu0 %vm803_vm1, %v802_v1  ;;  %737 = vmatpush3.msra.mxu0 %v310_v18  ;;  %v656_v59 = vld [vmem:[%s1015_s8] ss:$0 sm:$0xff]  ;;  %s780_s8 = scalar_lea.vmem %s637_s4, 32 }
  0x11   :  { %738 = vmatprep.subr.mxu0 %v802_v1  ;;  %p781_p0 = scmp.ne.s32.totalorder %s637_s4, %s780_s8  ;;  %p786_p2 = scmp.lt.s32.totalorder %s780_s8, %s780_s8 }
  0x12   :  { %739 = vmatpush3.msra.mxu0 %v309_v19 }
  0x13   :  { %740 = vmatprep.subr.mxu0 %v802_v1  ;;  %p787_p3 = por %p786_p2, %p785_p1 }
  0x14   :  { %741 = vmatpush3.msra.mxu0 %v308_v31 }
  0x15   :  { %742 = vmatprep.subr.mxu0 %v802_v1  ;;  %p788_p4 = pnand %p787_p3, %p781_p0 }
  0x16   :  { %743 = vmatpush3.msra.mxu0 %v307_v33 }
  0x17   :  { %758 = vmatprep.subr.mxu0 %v802_v1 }
  0xcf   :  { %v122_v11 = vpop.f32.mrf.mxu0 }
  0xd0   :  { %v123_v12 = vadd.f32 %v644_v10, %v122_v11 }
  0xd1   :  { %v708_v13 = vpop.f32.mrf.mxu0 }
  0xd2   :  { %712 = vmatmul.mubr.msk.f32.vlgmr.msra.gmra.mxu1 %vm134_vm3, %v123_v12 }
  0xd3   :  { %722 = vmatprep.mubr.msk.f32.mxu1 %vm803_vm1, %v802_v1  ;;  %715 = vmatpush3.msra.mxu1 %v217_v14 }
  0xd4   :  { %716 = vmatprep.subr.mxu1 %v802_v1 }
  0xd5   :  { %717 = vmatpush3.msra.mxu1 %v216_v15 }
  0xd6   :  { %718 = vmatprep.subr.mxu1 %v802_v1 }
  0xd7   :  { %719 = vmatpush3.msra.mxu1 %v215_v16 }
  0xd8   :  { %720 = vmatprep.subr.mxu1 %v802_v1 }
  0xd9   :  { %721 = vmatpush3.msra.mxu1 %v214_v17 }
  0xda   :  { %725 = vmatprep.subr.mxu1 %v802_v1 }
 0x192   :  { %v204_v21 = vpop.f32.mrf.mxu1 }
 0x193   :  { %v205_v22 = vadd.f32 %v647_v20, %v204_v21 }
 0x194   :  { %v713_v23 = vpop.f32.mrf.mxu1 }
 0x195   :  { %v649_v24 = vmul.f32 -1.442695, %v205_v22 }
 0x197   :  { %772 = vpow2.f32 %v649_v24 }
 0x1a4   :  { %v773_v25 = vpop.eup %772 }
 0x1a5   :  { %v211_v26 = vadd.f32 1.0, %v773_v25 }
 0x1a7   :  { %774 = vrcp.f32 %v211_v26 }
 0x1b4   :  { %v775_v28 = vpop.eup %774 }
 0x1b5   :  { %723 = vmatmul.mubr.msk.f32.vlgmr.msra.gmra.mxu1 %vm225_vm4, %v775_v28 }
 0x1b6   :  { %726 = vmatpush3.msra.mxu1 %v306_v27  ;;  %733 = vmatprep.mubr.msk.f32.mxu1 %vm803_vm1, %v802_v1 }
 0x1b7   :  { %727 = vmatprep.subr.mxu1 %v802_v1 }
 0x1b8   :  { %728 = vmatpush3.msra.mxu1 %v305_v29 }
 0x1b9   :  { %729 = vmatprep.subr.mxu1 %v802_v1 }
 0x1ba   :  { %730 = vmatpush3.msra.mxu1 %v304_v30 }
 0x1bb   :  { %731 = vmatprep.subr.mxu1 %v802_v1 }
 0x1bc   :  { %732 = vmatpush3.msra.mxu1 %v303_v32 }
 0x1bd   :  { %747 = vmatprep.subr.mxu1 %v802_v1 }
 0x275   :  { %v295_v35 = vpop.f32.mrf.mxu1 }
 0x276   :  { %v296_v36 = vadd.f32 %v650_v34, %v295_v35 }
 0x277   :  { %v724_v37 = vpop.f32.mrf.mxu1 }
 0x278   :  { %v316_v38 = vrot.slane %v296_v36, 2  ;;  %v389_v39 = vrot.slane %v296_v36, 4  ;;  %v462_v48 = vrot.slane %v296_v36, 6 }
 0x27a   :  { %734 = vmatmul.mubr.msk.f32.vlgmr.msra.gmra.mxu1 %vm225_vm4, %v316_v38  ;;  %745 = vmatmul.mubr.msk.f32.vlgmr.msra.gmra.mxu0 %vm225_vm4, %v389_v39 }
 0x27b   :  { %748 = vmatpush3.msra.mxu1 %v314_v40  ;;  %759 = vmatpush3.msra.mxu0 %v302_v41 }
 0x27c   :  { %749 = vmatprep.subr.mxu1 %v802_v1  ;;  %760 = vmatprep.subr.mxu0 %v802_v1 }
 0x27d   :  { %750 = vmatpush3.msra.mxu1 %v313_v42  ;;  %761 = vmatpush3.msra.mxu0 %v301_v43 }
 0x27e   :  { %751 = vmatprep.subr.mxu1 %v802_v1  ;;  %762 = vmatprep.subr.mxu0 %v802_v1 }
 0x27f   :  { %752 = vmatpush3.msra.mxu1 %v312_v44  ;;  %763 = vmatpush3.msra.mxu0 %v300_v45 }
 0x280   :  { %753 = vmatprep.subr.mxu1 %v802_v1  ;;  %764 = vmatprep.subr.mxu0 %v802_v1 }
 0x281   :  { %754 = vmatpush3.msra.mxu1 %v311_v46  ;;  %755 = vmatprep.mubr.msk.f32.mxu1 %vm803_vm1, %v802_v1 }
 0x282   :  { %765 = vmatpush3.msra.mxu0 %v299_v47  ;;  %766 = vmatprep.mubr.msk.f32.mxu0 %vm803_vm1, %v802_v1 }
 0x283   :  { %756 = vmatmul.mubr.msk.f32.vlgmr.msra.gmra.mxu1 %vm225_vm4, %v462_v48  ;;  %767 = vmatmul.mubr.msk.f32.vlgmr.msra.gmra.mxu0 %vm225_vm4, %v296_v36 }
 0x33a   :  { %v385_v49 = vpop.f32.mrf.mxu1  ;;  %v458_v50 = vpop.f32.mrf.mxu0 }
 0x33c   :  { %v735_v51 = vpop.f32.mrf.mxu1  ;;  %v746_v52 = vpop.f32.mrf.mxu0 }
 0x343   :  { %v531_v53 = vpop.f32.mrf.mxu1  ;;  %v604_v54 = vpop.f32.mrf.mxu0 }
 0x344   :  { %v605_v55 = vadd.f32 %v604_v54, %v385_v49 }
 0x345   :  { %v757_v56 = vpop.f32.mrf.mxu1  ;;  %v768_v57 = vpop.f32.mrf.mxu0 }
 0x346   :  { %v608_v58 = vadd.f32 %v605_v55, %v458_v50 }
 0x348   :  { %v609_v60 = vadd.f32 %v608_v58, %v531_v53 }
 0x34a   :  { %v616_v61 = vadd.f32 %v656_v59, %v609_v60 }
 0x34c   :  { %v618_v62 = vsel %vm617_vm5, %v616_v61, -inf }
 0x34d   :  { %619 = vmax.xlane.f32.xlu0 %v618_v62 }
 0x3d6   :  { %v620_v63 = vpop.xlane.xlu0 %619 }
 0x3d7   :  { %v621_v0 = vsub.f32 %v616_v61, %v620_v63 }
 0x3d9   :  { %v622_v1 = vmul.f32 1.442695, %v621_v0 }
 0x3db   :  { %776 = vpow2.f32 %v622_v1 }
 0x3e8   :  { %v777_v2 = vpop.eup %776 }
 0x3e9   :  { %v624_v3 = vsel %vm617_vm5, %v777_v2, 0.0 }
 0x3ea   :  { %625 = vadd.xlane.f32.xlu0 %v624_v3 }
 0x473   :  { %v626_v4 = vpop.xlane.xlu0 %625 }
 0x474   :  { %778 = vrcp.f32 %v626_v4 }
 0x481   :  { %v779_v5 = vpop.eup %778 }
 0x482   :  { %v628_v6 = vmul.f32 %v779_v5, %v777_v2 }
 0x484   :  { %629 = vst.msk [vmem:[#allocation2] sm:$0x3] %vm617_vm5, %v628_v6 }
 0x485   :  { %791 = shalt.err (!%p788_p4)
}
 0x486   :  { %639 = dma.vmem_to_hbm [thread:$0]  %s637_s4, 32, %s1016_s9, [#allocation3]  }
 0x487   :  { %800 = dma.done.wait [#allocation3], 32  }
 0x488   :  { %801 = vsyncadd [#allocation3], 4294967264 }
 0x489   :  { %643 = vsyncpa [#allocation3], 1 }

</bundles_post_ra>
